<compile_context>
chip_gen: v7x
topology: tpu7x:2x2x1
jax: 0.10.0
libtpu: 0.0.40
codegen_flags: <defaults>
</compile_context>

<pallas_src>
import functools

import jax
import jax.numpy as jnp
from jax.experimental import pallas as pl
from jax.experimental.pallas import tpu as pltpu


def _ffn_kernel(x_ref, w1_ref, b1_ref, w2_ref, b2_ref, o_ref, h_ref):
    # fc1 + bias + ReLU; stage hidden activation in explicit VMEM scratch so
    # large row tiles don't rely on opaque register spilling.
    h = jnp.dot(x_ref[...], w1_ref[...], preferred_element_type=jnp.float32)
    h_ref[...] = jnp.maximum(h + b1_ref[...], 0.0)

    # Dropout: identity in inference mode (model.eval()).
    # TODO(synk): training-mode dropout (p=0.1) via pltpu.prng_seed + prng_random_bits.

    # fc2 + bias. For f32 weights the hidden stays f32 (fp32 intermediate, like
    # torch); for bf16 weights it is cast down to hit the fast MXU path.
    h2 = h_ref[...]
    if h2.dtype != w2_ref.dtype:
        h2 = h2.astype(w2_ref.dtype)
    y = jnp.dot(h2, w2_ref[...], preferred_element_type=jnp.float32)
    o_ref[...] = (y + b2_ref[...]).astype(o_ref.dtype)


def _round_up(x, m):
    return ((x + m - 1) // m) * m


@functools.partial(jax.jit, static_argnames=("tile_m",))
def encoder_feed_forward(x, w1, b1, w2, b2, *, tile_m=256):
    """x: (batch, seq, model_dim); returns same shape.

    w1: (model_dim, hidden)  (= PyTorch fc1.weight.T)
    b1: (hidden,)
    w2: (hidden, model_dim)  (= PyTorch fc2.weight.T)
    b2: (model_dim,)
    """
    batch, seq, model_dim = x.shape
    hidden = w1.shape[1]
    rows = batch * seq

    # Row tile: as large as requested (feeds the MXU / amortizes per-step
    # pipeline overhead), but never larger than the sublane-rounded row count,
    # and always a multiple of 8 sublanes.
    tile = min(_round_up(tile_m, 8), _round_up(rows, 8))
    padded_rows = _round_up(rows, tile)
    grid = (padded_rows // tile,)

    x2d = x.reshape(rows, model_dim)
    if padded_rows != rows:
        x2d = jnp.pad(x2d, ((0, padded_rows - rows), (0, 0)))
    b1_2d = b1.reshape(1, hidden)
    b2_2d = b2.reshape(1, model_dim)

    itemsize = jnp.dtype(x.dtype).itemsize
    cost = pl.CostEstimate(
        flops=2 * 2 * padded_rows * model_dim * hidden,   # two matmuls
        transcendentals=0,
        bytes_accessed=(x2d.size + w1.size + b1.size + w2.size + b2.size
                        + padded_rows * model_dim) * itemsize,
    )

    out2d = pl.pallas_call(
        _ffn_kernel,
        out_shape=jax.ShapeDtypeStruct((padded_rows, model_dim), x.dtype),
        grid_spec=pltpu.PrefetchScalarGridSpec(
            num_scalar_prefetch=0,
            grid=grid,
            in_specs=[
                # x tile: (tile, model_dim), stepping over rows.
                pl.BlockSpec((tile, model_dim), lambda i: (i, 0)),
                # Weights / biases: grid-invariant blocks (constant index_map)
                # -> DMA'd once, stay resident in VMEM across all row tiles.
                # TODO(synk): for production-sized model_dim/hidden on v7x
                # (64 MiB VMEM) single-buffer these (pl.Buffered(1)) or add a
                # hidden-dim grid axis with an accumulator.
                pl.BlockSpec((model_dim, hidden), lambda i: (0, 0)),
                pl.BlockSpec((1, hidden), lambda i: (0, 0)),
                pl.BlockSpec((hidden, model_dim), lambda i: (0, 0)),
                pl.BlockSpec((1, model_dim), lambda i: (0, 0)),
            ],
            out_specs=pl.BlockSpec((tile, model_dim), lambda i: (i, 0)),
            scratch_shapes=[pltpu.VMEM((tile, hidden), jnp.float32)],
        ),
        compiler_params=pltpu.CompilerParams(
            dimension_semantics=("parallel",),
            vmem_limit_bytes=64 * 1024 * 1024,
        ),
        cost_estimate=cost,
    )(x2d, w1, b1_2d, w2, b2_2d)

    return out2d[:rows].reshape(batch, seq, model_dim)


if __name__ == "__main__":
    # Small shapes consistent with the module's forward:
    # batch=2, seq=8, model_dim=32, hidden_fc=64
    batch, seq, model_dim, hidden_fc = 2, 8, 32, 64

    key = jax.random.PRNGKey(0)
    kx, kw1, kb1, kw2, kb2 = jax.random.split(key, 5)

    x = jax.random.normal(kx, (batch, seq, model_dim), dtype=jnp.float32)

    # Deterministic parameter init (uniform, roughly PyTorch-Linear-style scale).
    bound1 = 1.0 / (model_dim ** 0.5)
    bound2 = 1.0 / (hidden_fc ** 0.5)
    w1 = jax.random.uniform(kw1, (model_dim, hidden_fc), jnp.float32,
                            -bound1, bound1)   # fc1.weight.T
    b1 = jax.random.uniform(kb1, (hidden_fc,), jnp.float32, -bound1, bound1)
    w2 = jax.random.uniform(kw2, (hidden_fc, model_dim), jnp.float32,
                            -bound2, bound2)   # fc2.weight.T
    b2 = jax.random.uniform(kb2, (model_dim,), jnp.float32, -bound2, bound2)

    out = encoder_feed_forward(x, w1, b1, w2, b2)
    out = jax.block_until_ready(out)

    # Pure-JAX reference (inference-mode dropout == identity)
    ref = jnp.maximum(x @ w1 + b1, 0.0) @ w2 + b2
    assert out.shape == x.shape
    assert jnp.allclose(out, ref, atol=1e-5, rtol=1e-5), "mismatch vs reference"

    print("KERNEL_OK")
</pallas_src>

<mosaic_0001>
module attributes {stable_mosaic.version = 11 : i64} {
  func.func @_ffn_kernel(%arg0: i32, %arg1: memref<16x32xf32, #tpu.memory_space<vmem>>, %arg2: memref<32x64xf32, #tpu.memory_space<vmem>>, %arg3: memref<1x64xf32, #tpu.memory_space<vmem>>, %arg4: memref<64x32xf32, #tpu.memory_space<vmem>>, %arg5: memref<1x32xf32, #tpu.memory_space<vmem>>, %arg6: memref<16x32xf32, #tpu.memory_space<vmem>>, %arg7: memref<16x64xf32, #tpu.memory_space<vmem>>) attributes {dimension_semantics = [#tpu.dimension_semantics<parallel>], iteration_bounds = array<i64: 1>, scalar_prefetch = 0 : i64, scratch_operands = 1 : i64, tpu.core_type = #tpu.core_type<tc>, window_params = [{transform_indices = @transform_0, window_bounds = array<i64: 16, 32>}, {pipeline_mode = #tpu.pipeline_mode<synchronous>, transform_indices = @transform_1, window_bounds = array<i64: 32, 64>}, {pipeline_mode = #tpu.pipeline_mode<synchronous>, transform_indices = @transform_2, window_bounds = array<i64: 1, 64>}, {pipeline_mode = #tpu.pipeline_mode<synchronous>, transform_indices = @transform_3, window_bounds = array<i64: 64, 32>}, {pipeline_mode = #tpu.pipeline_mode<synchronous>, transform_indices = @transform_4, window_bounds = array<i64: 1, 32>}, {transform_indices = @transform_5, window_bounds = array<i64: 16, 32>}]} {
    %c0 = arith.constant 0 : index
    %c0_0 = arith.constant 0 : index
    %0 = vector.load %arg1[%c0, %c0_0] : memref<16x32xf32, #tpu.memory_space<vmem>>, vector<16x32xf32>
    %c0_1 = arith.constant 0 : index
    %c0_2 = arith.constant 0 : index
    %1 = vector.load %arg2[%c0_1, %c0_2] : memref<32x64xf32, #tpu.memory_space<vmem>>, vector<32x64xf32>
    %cst = arith.constant dense<0.000000e+00> : vector<16x64xf32>
    %2 = tpu.matmul %0, %1, %cst {dimension_numbers = #tpu.dot_dimension_numbers<[1], [0], [0], [1], [0, 0, 1, 1], [], []>} : vector<16x32xf32>, vector<32x64xf32>, vector<16x64xf32> -> vector<16x64xf32>
    %c0_3 = arith.constant 0 : index
    %c0_4 = arith.constant 0 : index
    %3 = vector.load %arg3[%c0_3, %c0_4] : memref<1x64xf32, #tpu.memory_space<vmem>>, vector<1x64xf32>
    %4 = vector.broadcast %3 : vector<1x64xf32> to vector<16x64xf32>
    %5 = arith.addf %2, %4 : vector<16x64xf32>
    %cst_5 = arith.constant 0.000000e+00 : f32
    %6 = vector.broadcast %cst_5 : f32 to vector<16x64xf32>
    %7 = arith.maximumf %5, %6 : vector<16x64xf32>
    %c0_6 = arith.constant 0 : index
    %c0_7 = arith.constant 0 : index
    %8 = vector.load %arg7[%c0_6, %c0_7] : memref<16x64xf32, #tpu.memory_space<vmem>>, vector<16x64xf32>
    tpu.vector_store %arg7[%c0_6, %c0_7], %7 {strides = array<i32>} : memref<16x64xf32, #tpu.memory_space<vmem>>, vector<16x64xf32>,
    %c0_8 = arith.constant 0 : index
    %c0_9 = arith.constant 0 : index
    %9 = vector.load %arg7[%c0_8, %c0_9] : memref<16x64xf32, #tpu.memory_space<vmem>>, vector<16x64xf32>
    %c0_10 = arith.constant 0 : index
    %c0_11 = arith.constant 0 : index
    %10 = vector.load %arg4[%c0_10, %c0_11] : memref<64x32xf32, #tpu.memory_space<vmem>>, vector<64x32xf32>
    %cst_12 = arith.constant dense<0.000000e+00> : vector<16x32xf32>
    %11 = tpu.matmul %9, %10, %cst_12 {dimension_numbers = #tpu.dot_dimension_numbers<[1], [0], [0], [1], [0, 0, 1, 1], [], []>} : vector<16x64xf32>, vector<64x32xf32>, vector<16x32xf32> -> vector<16x32xf32>
    %c0_13 = arith.constant 0 : index
    %c0_14 = arith.constant 0 : index
    %12 = vector.load %arg5[%c0_13, %c0_14] : memref<1x32xf32, #tpu.memory_space<vmem>>, vector<1x32xf32>
    %13 = vector.broadcast %12 : vector<1x32xf32> to vector<16x32xf32>
    %14 = arith.addf %11, %13 : vector<16x32xf32>
    %c0_15 = arith.constant 0 : index
    %c0_16 = arith.constant 0 : index
    %15 = vector.load %arg6[%c0_15, %c0_16] : memref<16x32xf32, #tpu.memory_space<vmem>>, vector<16x32xf32>
    tpu.vector_store %arg6[%c0_15, %c0_16], %14 {strides = array<i32>} : memref<16x32xf32, #tpu.memory_space<vmem>>, vector<16x32xf32>,
    return
  }
  func.func @transform_0(%arg0: i32) -> (i32, i32) {
    %c0_i32 = arith.constant 0 : i32
    %c0_i32_0 = arith.constant 0 : i32
    return %arg0, %c0_i32 : i32, i32
  }
  func.func @transform_1(%arg0: i32) -> (i32, i32) {
    %c0_i32 = arith.constant 0 : i32
    %c0_i32_0 = arith.constant 0 : i32
    %c0_i32_1 = arith.constant 0 : i32
    return %c0_i32, %c0_i32_0 : i32, i32
  }
  func.func @transform_2(%arg0: i32) -> (i32, i32) {
    %c0_i32 = arith.constant 0 : i32
    %c0_i32_0 = arith.constant 0 : i32
    %c0_i32_1 = arith.constant 0 : i32
    return %c0_i32, %c0_i32_0 : i32, i32
  }
  func.func @transform_3(%arg0: i32) -> (i32, i32) {
    %c0_i32 = arith.constant 0 : i32
    %c0_i32_0 = arith.constant 0 : i32
    %c0_i32_1 = arith.constant 0 : i32
    return %c0_i32, %c0_i32_0 : i32, i32
  }
  func.func @transform_4(%arg0: i32) -> (i32, i32) {
    %c0_i32 = arith.constant 0 : i32
    %c0_i32_0 = arith.constant 0 : i32
    %c0_i32_1 = arith.constant 0 : i32
    return %c0_i32, %c0_i32_0 : i32, i32
  }
  func.func @transform_5(%arg0: i32) -> (i32, i32) {
    %c0_i32 = arith.constant 0 : i32
    %c0_i32_0 = arith.constant 0 : i32
    return %arg0, %c0_i32 : i32, i32
  }
}

</mosaic_0001>

<bundles_post_ra>
// kernel: encoder_feed_forward.1
= control target key start
LH: loop header
LB: loop body
LE: loop exit
PB: predicated region body
PF: predicated region fallthrough
CT: control target
= control target key end

     0   :  { %10 = vsyncpa [#allocation4], 0  ;;  %s661_s0 = inlined_call_operand.hbm [shape: f32[16,32], index: 0, kind: input, shape index: {}]   ;;  %s662_s1 = inlined_call_operand.hbm [shape: f32[32,64], index: 1, kind: input, shape index: {}]   ;;  %s663_s2 = inlined_call_operand.hbm [shape: f32[1,64], index: 2, kind: input, shape index: {}]   ;;  %s664_s3 = inlined_call_operand.hbm [shape: f32[64,32], index: 3, kind: input, shape index: {}]   ;;  %s665_s4 = inlined_call_operand.hbm [shape: f32[1,32], index: 4, kind: input, shape index: {}]   ;;  %s666_s5 = inlined_call_operand.hbm [shape: f32[16,32], index: 5, kind: output, shape index: {}]  }
   0x1   :  { %11 = vsyncpa [#allocation7], 0 }
   0x2   :  { %12 = vsyncpa [#allocation10], 0 }
   0x3   :  { %13 = vsyncpa [#allocation5], 0  ;;  %s528_s18 = smov [#allocation6]   ;;  %s529_s20 = smov [#allocation9]  }
   0x4   :  { %s31_s19 = sshll.u32 %s528_s18, 4  ;;  %s53_s21 = sshll.u32 %s529_s20, 4  ;;  %s32_s19 = int_to_ptr.vmem [resolvable:$true] %s31_s19  ;;  %s566_s21 = int_to_ptr.vmem [resolvable:$true] %s53_s21 }
   0x5   :  { %s388_s24 = scalar_lea.hbm %s662_s1, 512 }
   0x6   :  { %p389_p0 = scmp.ne.s32.totalorder %s662_s1, %s388_s24  ;;  %p392_p1 = scmp.lt.u32.totalorder %s388_s24, %s662_s1 }
   0x8   :  { %p394_p2 = pnand %p392_p1, %p389_p0 }
   0xa   :  { %397 = shalt.err (!%p394_p2)
}
   0xb   :  { %s398_s29 = scalar_lea.vmem %s32_s19, 512  ;;  %p403_p4 = scmp.lt.s32.totalorder %s32_s19, %s32_s19 }
   0xc   :  { %p399_p3 = scmp.ne.s32.totalorder %s32_s19, %s398_s29  ;;  %p404_p5 = scmp.lt.s32.totalorder %s398_s29, %s398_s29 }
   0xe   :  { %p405_p6 = por %p404_p5, %p403_p4 }
  0x10   :  { %p406_p7 = pnand %p405_p6, %p399_p3 }
  0x12   :  { %409 = shalt.err (!%p406_p7)
}
  0x13   :  { %s530_s30 = smov 128   ;;  %s531_s6 = smov 8  }
  0x14   :  { %37 = dma.hbm_to_vmem [thread:$0]  %s662_s1, 512, %s32_s19, [#allocation7], %s530_s30, %s530_s30, %s531_s6  }
  0x15   :  { %s410_s11 = scalar_lea.hbm %s664_s3, 1024 }
  0x16   :  { %p411_p8 = scmp.ne.s32.totalorder %s664_s3, %s410_s11  ;;  %p414_p9 = scmp.lt.u32.totalorder %s410_s11, %s664_s3 }
  0x18   :  { %p416_p10 = pnand %p414_p9, %p411_p8 }
  0x1a   :  { %419 = shalt.err (!%p416_p10)
}
  0x1b   :  { %s420_s16 = scalar_lea.vmem %s566_s21, 1024  ;;  %p425_p12 = scmp.lt.s32.totalorder %s566_s21, %s566_s21 }
  0x1c   :  { %p421_p11 = scmp.ne.s32.totalorder %s566_s21, %s420_s16  ;;  %p426_p13 = scmp.lt.s32.totalorder %s420_s16, %s420_s16 }
  0x1e   :  { %p427_p0 = por %p426_p13, %p425_p12 }
  0x20   :  { %p428_p1 = pnand %p427_p0, %p421_p11 }
  0x22   :  { %431 = shalt.err (!%p428_p1)
}
  0x23   :  { %59 = dma.hbm_to_vmem [thread:$0]  %s664_s3, 1024, %s566_s21, [#allocation10], %s530_s30, %s530_s30, %s531_s6  }
  0x24   :  { %s532_s18 = smov [#allocation3]   ;;  %s533_s20 = smov [#allocation8]  }
  0x25   :  { %s19_s19 = sshll.u32 %s532_s18, 4  ;;  %s44_s22 = sshll.u32 %s533_s20, 4  ;;  %s20_s19 = int_to_ptr.vmem [resolvable:$true] %s19_s19  ;;  %s45_s22 = int_to_ptr.vmem [resolvable:$true] %s44_s22 }
  0x26   :  { %s432_s25 = scalar_lea.hbm %s661_s0, 256 }
  0x27   :  { %p433_p2 = scmp.ne.s32.totalorder %s661_s0, %s432_s25  ;;  %p436_p3 = scmp.lt.u32.totalorder %s432_s25, %s661_s0 }
  0x29   :  { %p438_p4 = pnand %p436_p3, %p433_p2 }
  0x2b   :  { %441 = shalt.err (!%p438_p4)
}
  0x2c   :  { %s442_s3 = scalar_lea.vmem %s20_s19, 256  ;;  %p447_p6 = scmp.lt.s32.totalorder %s20_s19, %s20_s19 }
  0x2d   :  { %p443_p5 = scmp.ne.s32.totalorder %s20_s19, %s442_s3  ;;  %p448_p7 = scmp.lt.s32.totalorder %s442_s3, %s442_s3 }
  0x2f   :  { %p449_p8 = por %p448_p7, %p447_p6 }
  0x31   :  { %p450_p9 = pnand %p449_p8, %p443_p5 }
  0x33   :  { %453 = shalt.err (!%p450_p9)
}
  0x34   :  { %25 = dma.hbm_to_vmem [thread:$0]  %s661_s0, 256, %s20_s19, [#allocation4], %s530_s30, %s530_s30, %s531_s6  }
  0x35   :  { %s454_s10 = scalar_lea.hbm %s663_s2, 16 }
  0x36   :  { %p455_p10 = scmp.ne.s32.totalorder %s663_s2, %s454_s10  ;;  %p458_p11 = scmp.lt.u32.totalorder %s454_s10, %s663_s2 }
  0x38   :  { %p460_p12 = pnand %p458_p11, %p455_p10 }
  0x3a   :  { %463 = shalt.err (!%p460_p12)
}
  0x3b   :  { %s464_s15 = scalar_lea.vmem %s45_s22, 16  ;;  %s468_s16 = scalar_lea.vmem %s45_s22, 32 }
  0x3c   :  { %p465_p13 = scmp.ne.s32.totalorder %s45_s22, %s464_s15  ;;  %p469_p0 = scmp.lt.s32.totalorder %s45_s22, %s45_s22 }
  0x3d   :  { %p470_p1 = scmp.lt.s32.totalorder %s468_s16, %s464_s15 }
  0x3f   :  { %p471_p2 = por %p470_p1, %p469_p0 }
  0x41   :  { %p472_p3 = pnand %p471_p2, %p465_p13 }
  0x43   :  { %475 = shalt.err (!%p472_p3)
}
  0x44   :  { %47 = dma.hbm_to_vmem [thread:$0]  %s663_s2, 16, %s45_s22, [#allocation7]  }
  0x45   :  { %s534_s17 = smov [#allocation11]   ;;  %s476_s23 = scalar_lea.hbm %s665_s4, 16 }
  0x46   :  { %s66_s18 = sshll.u32 %s534_s17, 4  ;;  %p477_p4 = scmp.ne.s32.totalorder %s665_s4, %s476_s23  ;;  %s67_s18 = int_to_ptr.vmem [resolvable:$true] %s66_s18 }
  0x47   :  { %p480_p5 = scmp.lt.u32.totalorder %s476_s23, %s665_s4 }
  0x49   :  { %p482_p6 = pnand %p480_p5, %p477_p4 }
  0x4b   :  { %485 = shalt.err (!%p482_p6)
}
  0x4c   :  { %s486_s28 = scalar_lea.vmem %s67_s18, 16  ;;  %s490_s2 = scalar_lea.vmem %s67_s18, 32 }
  0x4d   :  { %p487_p7 = scmp.ne.s32.totalorder %s67_s18, %s486_s28  ;;  %p491_p8 = scmp.lt.s32.totalorder %s67_s18, %s67_s18 }
  0x4e   :  { %p492_p9 = scmp.lt.s32.totalorder %s490_s2, %s486_s28 }
  0x50   :  { %p493_p10 = por %p492_p9, %p491_p8 }
  0x52   :  { %p494_p11 = pnand %p493_p10, %p487_p7 }
  0x54   :  { %497 = shalt.err (!%p494_p11)
}
  0x55   :  { %69 = dma.hbm_to_vmem [thread:$0]  %s665_s4, 16, %s67_s18, [#allocation10]  }
  0x56   :  { %520 = dma.done.wait [#allocation4], 256  }
  0x57   :  { %521 = vsyncadd [#allocation4], 4294967040 }
  0x58   :  { %522 = dma.done.wait [#allocation7], 528  }
  0x59   :  { %523 = vsyncadd [#allocation7], 4294966768 }
  0x5a   :  { %524 = dma.done.wait [#allocation10], 1040  }
  0x5b   :  { %525 = vsyncadd [#allocation10], 4294966256  ;;  %vm98_vm0 = vcmask 261120   ;;  %v87_v0 = vld [vmem:[#allocation6] sm:$0xff]  ;;  %v88_v1 = vld [vmem:[#allocation6 + $0x8] sm:$0xff]  ;;  %vm182_vm1 = vcmask 523264  }
  0x5c   :  { %v89_v2 = vld [vmem:[#allocation6 + $0x10] sm:$0xff]  ;;  %v356_v3 = vpack.c.bf16 %v88_v1, %v87_v0  ;;  %v90_v4 = vld [vmem:[#allocation6 + $0x18] sm:$0xff]  ;;  %v187_v7 = vld [vmem:[#allocation9] sm:$0xff]  ;;  %s535_s4 = smov [#allocation12]  }
  0x5d   :  { %v85_v5 = vld [vmem:[#allocation3] sm:$0xff]  ;;  %v360_v6 = vpack.c.bf16 %v90_v4, %v89_v2  ;;  %v86_v10 = vld [vmem:[#allocation3 + $0x8] sm:$0xff]  ;;  %v191_v14 = vld [vmem:[#allocation9 + $0x20] sm:$0xff]  ;;  %s290_s3 = sshll.u32 %s535_s4, 4  ;;  %s291_s3 = int_to_ptr.vmem [resolvable:$true] %s290_s3 }
  0x5e   :  { %334 = vmatprep.mubr.msk.f32.mxu0 %vm98_vm0, %v85_v5  ;;  %v188_v8 = vld [vmem:[#allocation9 + $0x8] sm:$0xff]  ;;  %357 = vmatprep.subr.bf16.mxu0 %v356_v3  ;;  %v189_v11 = vld [vmem:[#allocation9 + $0x10] sm:$0xff]  ;;  %v190_v12 = vld [vmem:[#allocation9 + $0x18] sm:$0xff]  ;;  %s498_s21 = scalar_lea.vmem %s291_s3, 256  ;;  %p503_p13 = scmp.lt.s32.totalorder %s291_s3, %s291_s3 }
  0x5f   :  { %v364_v9 = vpack.c.bf16 %v188_v8, %v187_v7  ;;  %359 = vmatpush3.bf16.msra.mxu0 %v356_v3  ;;  %v368_v13 = vpack.c.bf16 %v190_v12, %v189_v11  ;;  %v192_v15 = vld [vmem:[#allocation9 + $0x28] sm:$0xff]  ;;  %v193_v16 = vld [vmem:[#allocation9 + $0x30] sm:$0xff]  ;;  %v194_v18 = vld [vmem:[#allocation9 + $0x38] sm:$0xff]  ;;  %p499_p12 = scmp.ne.s32.totalorder %s291_s3, %s498_s21  ;;  %p504_p0 = scmp.lt.s32.totalorder %s498_s21, %s498_s21 }
  0x60   :  { %361 = vmatprep.subr.bf16.mxu0 %v360_v6  ;;  %v372_v17 = vpack.c.bf16 %v192_v15, %v191_v14  ;;  %v376_v19 = vpack.c.bf16 %v194_v18, %v193_v16  ;;  %v304_v20 = vld [vmem:[#allocation8] ss:$0 sm:$0xff]  ;;  %v307_v29 = vld [vmem:[#allocation11] ss:$0 sm:$0xff] }
  0x61   :  { %365 = vmatprep.subr.bf16.mxu1 %v364_v9  ;;  %p505_p1 = por %p504_p0, %p503_p13 }
  0x62   :  { %367 = vmatpush3.bf16.msra.mxu1 %v364_v9 }
  0x63   :  { %363 = vmatpush3.bf16.msra.mxu0 %v360_v6  ;;  %369 = vmatprep.subr.bf16.mxu1 %v368_v13  ;;  %p506_p2 = pnand %p505_p1, %p499_p12 }
  0x66   :  { %335 = vmatmul.mubr.msk.f32.vlgmr.msra.gmra.mrb[0].mxu0 %vm98_vm0, %v86_v10  ;;  %371 = vmatpush3.bf16.msra.mxu1 %v368_v13 }
  0x67   :  { %373 = vmatprep.subr.bf16.mxu1 %v372_v17 }
  0x6a   :  { %375 = vmatpush3.bf16.msra.mxu1 %v372_v17 }
  0x6b   :  { %377 = vmatprep.subr.bf16.mxu1 %v376_v19 }
  0x6e   :  { %379 = vmatpush3.bf16.msra.mxu1 %v376_v19 }
 0x139   :  { %v336_v21 = vpop.f32.mrb[0].mxu0 }
 0x13a   :  { %v177_v22 = vadd.f32 %v336_v21, %v304_v20  ;;  %v171_v23 = vpop.f32.mrb[1].mxu0 }
 0x13b   :  { %v172_v24 = vadd.f32 %v304_v20, %v171_v23 }
 0x13c   :  { %v181_v25 = vmax.f32 %v177_v22, 0.0 }
 0x13d   :  { %v180_v26 = vmax.f32 %v172_v24, 0.0 }
 0x13e   :  { %184 = vst.msk [vmem:[#allocation2 + $0x8] sm:$0xff] %vm182_vm1, %v181_v25 }
 0x13f   :  { %183 = vst.msk [vmem:[#allocation2] sm:$0xff] %vm182_vm1, %v180_v26 }
 0x145   :  { %v186_v28 = vld [vmem:[#allocation2 + $0x8] sm:$0xff] }
 0x146   :  { %v185_v27 = vld [vmem:[#allocation2] sm:$0xff] }
 0x147   :  { %353 = vmatprep.mubr.msk.f32.mxu1 %vm182_vm1, %v185_v27 }
 0x148   :  { %354 = vmatmul.mubr.msk.f32.vlgmr.msra.gmra.mrb[0].mxu1 %vm182_vm1, %v186_v28 }
 0x21b   :  { %v355_v30 = vpop.f32.mrb[0].mxu1 }
 0x21c   :  { %v280_v31 = vadd.f32 %v355_v30, %v307_v29  ;;  %v274_v32 = vpop.f32.mrb[1].mxu1 }
 0x21d   :  { %v275_v33 = vadd.f32 %v307_v29, %v274_v32 }
 0x21e   :  { %284 = vst.msk [vmem:[#allocation12 + $0x8] sm:$0xff] %vm98_vm0, %v280_v31 }
 0x21f   :  { %283 = vst.msk [vmem:[#allocation12] sm:$0xff] %vm98_vm0, %v275_v33 }
 0x220   :  { %509 = shalt.err (!%p506_p2)
}
 0x221   :  { %s510_s9 = scalar_lea.hbm %s666_s5, 256 }
 0x222   :  { %p511_p3 = scmp.ne.s32.totalorder %s666_s5, %s510_s9  ;;  %p514_p4 = scmp.lt.u32.totalorder %s510_s9, %s666_s5 }
 0x224   :  { %p516_p5 = pnand %p514_p4, %p511_p3 }
 0x226   :  { %519 = shalt.err (!%p516_p5)
}
 0x227   :  { %296 = dma.vmem_to_hbm [thread:$0]  %s291_s3, 256, %s666_s5, [#allocation5], %s530_s30, %s530_s30, %s531_s6  }
 0x228   :  { %526 = dma.done.wait [#allocation5], 256  }
 0x229   :  { %527 = vsyncadd [#allocation5], 4294967040 }
 0x22a   :  { %300 = vsyncpa [#allocation4], 1 }
 0x22b   :  { %301 = vsyncpa [#allocation7], 1 }
 0x22c   :  { %302 = vsyncpa [#allocation10], 1 }
 0x22d   :  { %303 = vsyncpa [#allocation5], 1 }

</bundles_post_ra>
